<compile_context>
chip_gen: v7x
topology: tpu7x:2x2x1
jax: 0.10.0
libtpu: 0.0.40
codegen_flags: <defaults>
</compile_context>

<pallas_src>
import jax
import jax.numpy as jnp
from jax.experimental import pallas as pl
from jax.experimental.pallas import tpu as pltpu

LANES = 128
SUBLANES = 8
MAX_TILE_ROWS = 2048                       # hard cap on rows per grid step
VMEM_INPUT_BUDGET = 16 * 1024 * 1024       # double-buffered input budget (bytes)


def _make_kernel(weights_scaled):
    """Build a kernel closed over the (weight / numel) compile-time scalars."""
    num_levels = len(weights_scaled)

    def kernel(*refs):
        # refs = (pred_0, ..., pred_{L-1}, target, out)
        pred_refs = refs[:num_levels]
        tgt_ref = refs[num_levels]
        out_ref = refs[num_levels + 1]

        tgt = tgt_ref[...].astype(jnp.float32)            # (T8, 8, 128)
        acc = jnp.zeros((SUBLANES, LANES), jnp.float32)   # lane-dense partial
        for l in range(num_levels):
            d = pred_refs[l][...].astype(jnp.float32) - tgt
            # Reduce only the leading (vreg-block) axis: pure VPU adds,
            # no cross-lane XLU work in the hot loop.  Weight/mean scalar is
            # applied once to the (8,128) reduced partial (cheap).
            acc = acc + weights_scaled[l] * jnp.sum(d * d, axis=0)
        out_ref[0] = acc                                   # (8, 128) per-tile partial

    return kernel


def deep_supervision_mse_loss(preds, target, weights=None):
    """Pallas implementation of DeepSupervisionLoss(MSELoss(reduction='mean'))."""
    if weights is None:
        weights = [1.0, 0.8, 0.6, 0.4, 0.2]

    if not isinstance(preds, (list, tuple)):
        # forward() returns loss_fn(preds, target) directly (no weighting).
        preds = [preds]
        weights = [1.0]

    # Levels beyond len(weights) are ignored by the reference module.
    num_levels = min(len(preds), len(weights))
    preds = [jnp.asarray(p) for p in list(preds)[:num_levels]]
    weights = [float(w) for w in list(weights)[:num_levels]]
    target = jnp.asarray(target)

    numel = int(target.size)

    # --- adaptive row tiling over a lane-dense slab --------------------------
    rows_needed = -(-numel // LANES)                               # cdiv
    rows_needed8 = -(-rows_needed // SUBLANES) * SUBLANES          # multiple of 8

    # Bytes DMA'd into VMEM per row (all levels + target), double-buffered.
    bytes_per_row = sum(
        LANES * jnp.dtype(x.dtype).itemsize for x in (preds + [target])
    )
    budget_rows = max(SUBLANES, VMEM_INPUT_BUDGET // (2 * bytes_per_row))
    budget_rows = (budget_rows // SUBLANES) * SUBLANES
    tile_rows = min(MAX_TILE_ROWS, budget_rows, rows_needed8)
    tile_rows = max(SUBLANES, tile_rows)

    t8 = tile_rows // SUBLANES
    n_tiles = -(-rows_needed // tile_rows)
    padded_numel = n_tiles * tile_rows * LANES

    def to_slab(x):
        # TODO(synk): like the PyTorch module, this assumes every prediction
        # level already has the target's shape (no built-in resampling).
        flat = x.reshape(-1)
        if flat.size != padded_numel:
            flat = jnp.pad(flat, (0, padded_numel - flat.size))
        return flat.reshape(n_tiles * t8, SUBLANES, LANES)

    slabs = [to_slab(p) for p in preds] + [to_slab(target)]

    # Fold the MSE mean divisor into the per-level weights (true numel,
    # so zero-padded elements don't bias the loss).
    w_scaled = tuple(w / float(numel) for w in weights)
    kernel = _make_kernel(w_scaled)

    in_bytes = sum(int(s.size) * jnp.dtype(s.dtype).itemsize for s in slabs)
    cost = pl.CostEstimate(
        flops=3 * num_levels * padded_numel,
        transcendentals=0,
        bytes_accessed=in_bytes + n_tiles * SUBLANES * LANES * 4,
    )

    in_specs = [
        pl.BlockSpec((t8, SUBLANES, LANES), lambda i: (i, 0, 0)) for _ in slabs
    ]
    partials = pl.pallas_call(
        kernel,
        out_shape=jax.ShapeDtypeStruct((n_tiles, SUBLANES, LANES), jnp.float32),
        grid=(n_tiles,),
        in_specs=in_specs,
        out_specs=pl.BlockSpec((1, SUBLANES, LANES), lambda i: (i, 0, 0)),
        compiler_params=pltpu.CompilerParams(
            dimension_semantics=("parallel",),
        ),
        cost_estimate=cost,
    )(*slabs)

    # Tiny final reduction over the lane-dense per-tile partials.
    return jnp.sum(partials)


if __name__ == "__main__":
    key = jax.random.PRNGKey(0)
    B, C, H, W = 2, 4, 16, 16
    n_levels = 5

    keys = jax.random.split(key, n_levels + 1)
    preds = [
        jax.random.normal(keys[i], (B, C, H, W), dtype=jnp.float32)
        for i in range(n_levels)
    ]
    target = jax.random.normal(keys[-1], (B, C, H, W), dtype=jnp.float32)

    # Pallas kernel (list-of-preds path)
    loss = jax.block_until_ready(deep_supervision_mse_loss(preds, target))

    # Pure-JAX reference of the PyTorch forward
    wts = [1.0, 0.8, 0.6, 0.4, 0.2]
    ref = sum(wts[i] * jnp.mean((preds[i] - target) ** 2) for i in range(n_levels))
    assert jnp.allclose(loss, ref, rtol=1e-5, atol=1e-5), (loss, ref)

    # Single-tensor path (preds not a list)
    loss_single = jax.block_until_ready(deep_supervision_mse_loss(preds[0], target))
    ref_single = jnp.mean((preds[0] - target) ** 2)
    assert jnp.allclose(loss_single, ref_single, rtol=1e-5, atol=1e-5), (
        loss_single,
        ref_single,
    )

    # Non-aligned shape path (exercises zero-padding + true-numel mean)
    tgt_odd = jax.random.normal(keys[0], (3, 5, 7), dtype=jnp.float32)
    preds_odd = [
        jax.random.normal(keys[i + 1], (3, 5, 7), dtype=jnp.float32) for i in range(2)
    ]
    loss_odd = jax.block_until_ready(deep_supervision_mse_loss(preds_odd, tgt_odd))
    ref_odd = sum(wts[i] * jnp.mean((preds_odd[i] - tgt_odd) ** 2) for i in range(2))
    assert jnp.allclose(loss_odd, ref_odd, rtol=1e-5, atol=1e-5), (loss_odd, ref_odd)

    # Mixed-dtype path (bf16 preds vs f32 target): cast happens in-kernel.
    preds_bf16 = [p.astype(jnp.bfloat16) for p in preds[:3]]
    loss_bf16 = jax.block_until_ready(deep_supervision_mse_loss(preds_bf16, target))
    ref_bf16 = sum(
        wts[i] * jnp.mean((preds_bf16[i].astype(jnp.float32) - target) ** 2)
        for i in range(3)
    )
    assert jnp.allclose(loss_bf16, ref_bf16, rtol=1e-2, atol=1e-2), (
        loss_bf16,
        ref_bf16,
    )

    print("KERNEL_OK")
</pallas_src>

<mosaic_0001>
module attributes {stable_mosaic.version = 11 : i64} {
  func.func @kernel(%arg0: i32, %arg1: memref<2x8x128xf32, #tpu.memory_space<vmem>>, %arg2: memref<2x8x128xf32, #tpu.memory_space<vmem>>, %arg3: memref<2x8x128xf32, #tpu.memory_space<vmem>>, %arg4: memref<2x8x128xf32, #tpu.memory_space<vmem>>, %arg5: memref<2x8x128xf32, #tpu.memory_space<vmem>>, %arg6: memref<2x8x128xf32, #tpu.memory_space<vmem>>, %arg7: memref<1x8x128xf32, #tpu.memory_space<vmem>>) attributes {dimension_semantics = [#tpu.dimension_semantics<parallel>], iteration_bounds = array<i64: 1>, scalar_prefetch = 0 : i64, scratch_operands = 0 : i64, tpu.core_type = #tpu.core_type<tc>, window_params = [{transform_indices = @transform_0, window_bounds = array<i64: 2, 8, 128>}, {transform_indices = @transform_1, window_bounds = array<i64: 2, 8, 128>}, {transform_indices = @transform_2, window_bounds = array<i64: 2, 8, 128>}, {transform_indices = @transform_3, window_bounds = array<i64: 2, 8, 128>}, {transform_indices = @transform_4, window_bounds = array<i64: 2, 8, 128>}, {transform_indices = @transform_5, window_bounds = array<i64: 2, 8, 128>}, {transform_indices = @transform_6, window_bounds = array<i64: 1, 8, 128>}]} {
    %c0 = arith.constant 0 : index
    %c0_0 = arith.constant 0 : index
    %c0_1 = arith.constant 0 : index
    %0 = vector.load %arg6[%c0, %c0_0, %c0_1] : memref<2x8x128xf32, #tpu.memory_space<vmem>>, vector<2x8x128xf32>
    %cst = arith.constant 0.000000e+00 : f32
    %1 = vector.broadcast %cst : f32 to vector<8x128xf32>
    %c0_2 = arith.constant 0 : index
    %c0_3 = arith.constant 0 : index
    %c0_4 = arith.constant 0 : index
    %2 = vector.load %arg1[%c0_2, %c0_3, %c0_4] : memref<2x8x128xf32, #tpu.memory_space<vmem>>, vector<2x8x128xf32>
    %3 = arith.subf %2, %0 : vector<2x8x128xf32>
    %4 = arith.mulf %3, %3 : vector<2x8x128xf32>
    %cst_5 = arith.constant dense<0.000000e+00> : vector<8x128xf32>
    %5 = vector.multi_reduction <add>, %4, %cst_5 [0] : vector<2x8x128xf32> to vector<8x128xf32>
    %cst_6 = arith.constant 4.8828125E-4 : f32
    %6 = vector.broadcast %cst_6 : f32 to vector<8x128xf32>
    %7 = arith.mulf %6, %5 : vector<8x128xf32>
    %8 = arith.addf %1, %7 : vector<8x128xf32>
    %c0_7 = arith.constant 0 : index
    %c0_8 = arith.constant 0 : index
    %c0_9 = arith.constant 0 : index
    %9 = vector.load %arg2[%c0_7, %c0_8, %c0_9] : memref<2x8x128xf32, #tpu.memory_space<vmem>>, vector<2x8x128xf32>
    %10 = arith.subf %9, %0 : vector<2x8x128xf32>
    %11 = arith.mulf %10, %10 : vector<2x8x128xf32>
    %cst_10 = arith.constant dense<0.000000e+00> : vector<8x128xf32>
    %12 = vector.multi_reduction <add>, %11, %cst_10 [0] : vector<2x8x128xf32> to vector<8x128xf32>
    %cst_11 = arith.constant 3.906250e-04 : f32
    %13 = vector.broadcast %cst_11 : f32 to vector<8x128xf32>
    %14 = arith.mulf %13, %12 : vector<8x128xf32>
    %15 = arith.addf %8, %14 : vector<8x128xf32>
    %c0_12 = arith.constant 0 : index
    %c0_13 = arith.constant 0 : index
    %c0_14 = arith.constant 0 : index
    %16 = vector.load %arg3[%c0_12, %c0_13, %c0_14] : memref<2x8x128xf32, #tpu.memory_space<vmem>>, vector<2x8x128xf32>
    %17 = arith.subf %16, %0 : vector<2x8x128xf32>
    %18 = arith.mulf %17, %17 : vector<2x8x128xf32>
    %cst_15 = arith.constant dense<0.000000e+00> : vector<8x128xf32>
    %19 = vector.multi_reduction <add>, %18, %cst_15 [0] : vector<2x8x128xf32> to vector<8x128xf32>
    %cst_16 = arith.constant 2.92968762E-4 : f32
    %20 = vector.broadcast %cst_16 : f32 to vector<8x128xf32>
    %21 = arith.mulf %20, %19 : vector<8x128xf32>
    %22 = arith.addf %15, %21 : vector<8x128xf32>
    %c0_17 = arith.constant 0 : index
    %c0_18 = arith.constant 0 : index
    %c0_19 = arith.constant 0 : index
    %23 = vector.load %arg4[%c0_17, %c0_18, %c0_19] : memref<2x8x128xf32, #tpu.memory_space<vmem>>, vector<2x8x128xf32>
    %24 = arith.subf %23, %0 : vector<2x8x128xf32>
    %25 = arith.mulf %24, %24 : vector<2x8x128xf32>
    %cst_20 = arith.constant dense<0.000000e+00> : vector<8x128xf32>
    %26 = vector.multi_reduction <add>, %25, %cst_20 [0] : vector<2x8x128xf32> to vector<8x128xf32>
    %cst_21 = arith.constant 1.95312503E-4 : f32
    %27 = vector.broadcast %cst_21 : f32 to vector<8x128xf32>
    %28 = arith.mulf %27, %26 : vector<8x128xf32>
    %29 = arith.addf %22, %28 : vector<8x128xf32>
    %c0_22 = arith.constant 0 : index
    %c0_23 = arith.constant 0 : index
    %c0_24 = arith.constant 0 : index
    %30 = vector.load %arg5[%c0_22, %c0_23, %c0_24] : memref<2x8x128xf32, #tpu.memory_space<vmem>>, vector<2x8x128xf32>
    %31 = arith.subf %30, %0 : vector<2x8x128xf32>
    %32 = arith.mulf %31, %31 : vector<2x8x128xf32>
    %cst_25 = arith.constant dense<0.000000e+00> : vector<8x128xf32>
    %33 = vector.multi_reduction <add>, %32, %cst_25 [0] : vector<2x8x128xf32> to vector<8x128xf32>
    %cst_26 = arith.constant 9.76562514E-5 : f32
    %34 = vector.broadcast %cst_26 : f32 to vector<8x128xf32>
    %35 = arith.mulf %34, %33 : vector<8x128xf32>
    %36 = arith.addf %29, %35 : vector<8x128xf32>
    %c0_27 = arith.constant 0 : index
    %c0_28 = arith.constant 0 : index
    %c0_29 = arith.constant 0 : index
    %37 = vector.load %arg7[%c0_27, %c0_28, %c0_29] : memref<1x8x128xf32, #tpu.memory_space<vmem>>, vector<1x8x128xf32>
    %38 = vector.shape_cast %37 : vector<1x8x128xf32> to vector<8x128xf32>
    %39 = vector.shape_cast %36 : vector<8x128xf32> to vector<1x8x128xf32>
    tpu.vector_store %arg7[%c0_27, %c0_28, %c0_29], %39 {strides = array<i32>} : memref<1x8x128xf32, #tpu.memory_space<vmem>>, vector<1x8x128xf32>,
    return
  }
  func.func @transform_0(%arg0: i32) -> (i32, i32, i32) {
    %c0_i32 = arith.constant 0 : i32
    %c0_i32_0 = arith.constant 0 : i32
    %c0_i32_1 = arith.constant 0 : i32
    return %arg0, %c0_i32, %c0_i32_0 : i32, i32, i32
  }
  func.func @transform_1(%arg0: i32) -> (i32, i32, i32) {
    %c0_i32 = arith.constant 0 : i32
    %c0_i32_0 = arith.constant 0 : i32
    %c0_i32_1 = arith.constant 0 : i32
    return %arg0, %c0_i32, %c0_i32_0 : i32, i32, i32
  }
  func.func @transform_2(%arg0: i32) -> (i32, i32, i32) {
    %c0_i32 = arith.constant 0 : i32
    %c0_i32_0 = arith.constant 0 : i32
    %c0_i32_1 = arith.constant 0 : i32
    return %arg0, %c0_i32, %c0_i32_0 : i32, i32, i32
  }
  func.func @transform_3(%arg0: i32) -> (i32, i32, i32) {
    %c0_i32 = arith.constant 0 : i32
    %c0_i32_0 = arith.constant 0 : i32
    %c0_i32_1 = arith.constant 0 : i32
    return %arg0, %c0_i32, %c0_i32_0 : i32, i32, i32
  }
  func.func @transform_4(%arg0: i32) -> (i32, i32, i32) {
    %c0_i32 = arith.constant 0 : i32
    %c0_i32_0 = arith.constant 0 : i32
    %c0_i32_1 = arith.constant 0 : i32
    return %arg0, %c0_i32, %c0_i32_0 : i32, i32, i32
  }
  func.func @transform_5(%arg0: i32) -> (i32, i32, i32) {
    %c0_i32 = arith.constant 0 : i32
    %c0_i32_0 = arith.constant 0 : i32
    %c0_i32_1 = arith.constant 0 : i32
    return %arg0, %c0_i32, %c0_i32_0 : i32, i32, i32
  }
  func.func @transform_6(%arg0: i32) -> (i32, i32, i32) {
    %c0_i32 = arith.constant 0 : i32
    %c0_i32_0 = arith.constant 0 : i32
    %c0_i32_1 = arith.constant 0 : i32
    return %arg0, %c0_i32, %c0_i32_0 : i32, i32, i32
  }
}

</mosaic_0001>

<bundles_post_ra>
// kernel: tpu_custom_call.1
= control target key start
LH: loop header
LB: loop body
LE: loop exit
PB: predicated region body
PF: predicated region fallthrough
CT: control target
= control target key end

     0   :  { %11 = vsyncpa [#allocation3], 0  ;;  %s455_s0 = inlined_call_operand.hbm [shape: f32[2,8,128], index: 0, kind: input, shape index: {}]   ;;  %s456_s1 = inlined_call_operand.hbm [shape: f32[2,8,128], index: 1, kind: input, shape index: {}]   ;;  %s457_s2 = inlined_call_operand.hbm [shape: f32[2,8,128], index: 2, kind: input, shape index: {}]   ;;  %s458_s3 = inlined_call_operand.hbm [shape: f32[2,8,128], index: 3, kind: input, shape index: {}]   ;;  %s459_s4 = inlined_call_operand.hbm [shape: f32[2,8,128], index: 4, kind: input, shape index: {}]   ;;  %s460_s5 = inlined_call_operand.vmem [shape: f32[2,8,128], index: 5, kind: input, shape index: {}]   ;;  %s461_s6 = inlined_call_operand.hbm [shape: f32[1,8,128], index: 6, kind: output, shape index: {}]  }
   0x1   :  { %12 = vsyncpa [#allocation6], 0 }
   0x2   :  { %13 = vsyncpa [#allocation9], 0 }
   0x3   :  { %14 = vsyncpa [#allocation4], 0  ;;  %s305_s21 = smov [#allocation5]   ;;  %s306_s23 = smov [#allocation8]  }
   0x4   :  { %s32_s22 = sshll.u32 %s305_s21, 4  ;;  %s56_s24 = sshll.u32 %s306_s23, 4  ;;  %s33_s22 = int_to_ptr.vmem [resolvable:$true] %s32_s22  ;;  %s348_s24 = int_to_ptr.vmem [resolvable:$true] %s56_s24 }
   0x5   :  { %s165_s27 = scalar_lea.hbm %s456_s1, 256 }
   0x6   :  { %p166_p0 = scmp.ne.s32.totalorder %s456_s1, %s165_s27  ;;  %p169_p1 = scmp.lt.u32.totalorder %s165_s27, %s456_s1 }
   0x8   :  { %p171_p2 = pnand %p169_p1, %p166_p0 }
   0xa   :  { %174 = shalt.err (!%p171_p2)
}
   0xb   :  { %s175_s8 = scalar_lea.vmem %s33_s22, 256  ;;  %p180_p4 = scmp.lt.s32.totalorder %s33_s22, %s33_s22 }
   0xc   :  { %p176_p3 = scmp.ne.s32.totalorder %s33_s22, %s175_s8  ;;  %p181_p5 = scmp.lt.s32.totalorder %s175_s8, %s175_s8 }
   0xe   :  { %p182_p6 = por %p181_p5, %p180_p4 }
  0x10   :  { %p183_p7 = pnand %p182_p6, %p176_p3 }
  0x12   :  { %186 = shalt.err (!%p183_p7)
}
  0x13   :  { %s307_s9 = smov 128   ;;  %s308_s10 = smov 8  }
  0x14   :  { %38 = dma.hbm_to_vmem [thread:$0]  %s456_s1, 256, %s33_s22, [#allocation6], %s307_s9, %s307_s9, %s308_s10  }
  0x15   :  { %s187_s15 = scalar_lea.hbm %s458_s3, 256 }
  0x16   :  { %p188_p8 = scmp.ne.s32.totalorder %s458_s3, %s187_s15  ;;  %p191_p9 = scmp.lt.u32.totalorder %s187_s15, %s458_s3 }
  0x18   :  { %p193_p10 = pnand %p191_p9, %p188_p8 }
  0x1a   :  { %196 = shalt.err (!%p193_p10)
}
  0x1b   :  { %s197_s20 = scalar_lea.vmem %s348_s24, 256  ;;  %p202_p12 = scmp.lt.s32.totalorder %s348_s24, %s348_s24 }
  0x1c   :  { %p198_p11 = scmp.ne.s32.totalorder %s348_s24, %s197_s20  ;;  %p203_p13 = scmp.lt.s32.totalorder %s197_s20, %s197_s20 }
  0x1e   :  { %p204_p0 = por %p203_p13, %p202_p12 }
  0x20   :  { %p205_p1 = pnand %p204_p0, %p198_p11 }
  0x22   :  { %208 = shalt.err (!%p205_p1)
}
  0x23   :  { %62 = dma.hbm_to_vmem [thread:$0]  %s458_s3, 256, %s348_s24, [#allocation9], %s307_s9, %s307_s9, %s308_s10  }
  0x24   :  { %s309_s22 = smov [#allocation2]   ;;  %s310_s25 = smov [#allocation7]  }
  0x25   :  { %s20_s23 = sshll.u32 %s309_s22, 4  ;;  %s44_s26 = sshll.u32 %s310_s25, 4  ;;  %s21_s23 = int_to_ptr.vmem [resolvable:$true] %s20_s23  ;;  %s385_s26 = int_to_ptr.vmem [resolvable:$true] %s44_s26 }
  0x26   :  { %s209_s29 = scalar_lea.hbm %s455_s0, 256 }
  0x27   :  { %p210_p2 = scmp.ne.s32.totalorder %s455_s0, %s209_s29  ;;  %p213_p3 = scmp.lt.u32.totalorder %s209_s29, %s455_s0 }
  0x29   :  { %p215_p4 = pnand %p213_p3, %p210_p2 }
  0x2b   :  { %218 = shalt.err (!%p215_p4)
}
  0x2c   :  { %s219_s3 = scalar_lea.vmem %s21_s23, 256  ;;  %p224_p6 = scmp.lt.s32.totalorder %s21_s23, %s21_s23 }
  0x2d   :  { %p220_p5 = scmp.ne.s32.totalorder %s21_s23, %s219_s3  ;;  %p225_p7 = scmp.lt.s32.totalorder %s219_s3, %s219_s3 }
  0x2f   :  { %p226_p8 = por %p225_p7, %p224_p6 }
  0x31   :  { %p227_p9 = pnand %p226_p8, %p220_p5 }
  0x33   :  { %230 = shalt.err (!%p227_p9)
}
  0x34   :  { %26 = dma.hbm_to_vmem [thread:$0]  %s455_s0, 256, %s21_s23, [#allocation3], %s307_s9, %s307_s9, %s308_s10  }
  0x35   :  { %s231_s15 = scalar_lea.hbm %s457_s2, 256 }
  0x36   :  { %p232_p10 = scmp.ne.s32.totalorder %s457_s2, %s231_s15  ;;  %p235_p11 = scmp.lt.u32.totalorder %s231_s15, %s457_s2 }
  0x38   :  { %p237_p12 = pnand %p235_p11, %p232_p10 }
  0x3a   :  { %240 = shalt.err (!%p237_p12)
}
  0x3b   :  { %s241_s20 = scalar_lea.vmem %s385_s26, 256  ;;  %p246_p0 = scmp.lt.s32.totalorder %s385_s26, %s385_s26 }
  0x3c   :  { %p242_p13 = scmp.ne.s32.totalorder %s385_s26, %s241_s20  ;;  %p247_p1 = scmp.lt.s32.totalorder %s241_s20, %s241_s20 }
  0x3e   :  { %p248_p2 = por %p247_p1, %p246_p0 }
  0x40   :  { %p249_p3 = pnand %p248_p2, %p242_p13 }
  0x42   :  { %252 = shalt.err (!%p249_p3)
}
  0x43   :  { %50 = dma.hbm_to_vmem [thread:$0]  %s457_s2, 256, %s385_s26, [#allocation6], %s307_s9, %s307_s9, %s308_s10  }
  0x44   :  { %s311_s21 = smov [#allocation10]   ;;  %s253_s27 = scalar_lea.hbm %s459_s4, 256 }
  0x45   :  { %s68_s22 = sshll.u32 %s311_s21, 4  ;;  %p254_p4 = scmp.ne.s32.totalorder %s459_s4, %s253_s27  ;;  %s69_s22 = int_to_ptr.vmem [resolvable:$true] %s68_s22 }
  0x46   :  { %p257_p5 = scmp.lt.u32.totalorder %s253_s27, %s459_s4 }
  0x48   :  { %p259_p6 = pnand %p257_p5, %p254_p4 }
  0x4a   :  { %262 = shalt.err (!%p259_p6)
}
  0x4b   :  { %s263_s8 = scalar_lea.vmem %s69_s22, 256  ;;  %p268_p8 = scmp.lt.s32.totalorder %s69_s22, %s69_s22 }
  0x4c   :  { %p264_p7 = scmp.ne.s32.totalorder %s69_s22, %s263_s8  ;;  %p269_p9 = scmp.lt.s32.totalorder %s263_s8, %s263_s8 }
  0x4e   :  { %p270_p10 = por %p269_p9, %p268_p8 }
  0x50   :  { %p271_p11 = pnand %p270_p10, %p264_p7 }
  0x52   :  { %274 = shalt.err (!%p271_p11)
}
  0x53   :  { %74 = dma.hbm_to_vmem [thread:$0]  %s459_s4, 256, %s69_s22, [#allocation9], %s307_s9, %s307_s9, %s308_s10  }
  0x54   :  { %297 = dma.done.wait [#allocation3], 256  }
  0x55   :  { %298 = vsyncadd [#allocation3], 4294967040 }
  0x56   :  { %299 = dma.done.wait [#allocation6], 512  }
  0x57   :  { %300 = vsyncadd [#allocation6], 4294966784 }
  0x58   :  { %301 = dma.done.wait [#allocation9], 512  }
  0x59   :  { %302 = vsyncadd [#allocation9], 4294966784  ;;  %v92_v0 = vld [vmem:[%s460_s5] sm:$0xff]  ;;  %v93_v1 = vld [vmem:[%s460_s5 + $0x8] sm:$0xff]  ;;  %s312_s4 = smov [#allocation11]  }
  0x5a   :  { %v94_v2 = vld [vmem:[#allocation2] sm:$0xff]  ;;  %v95_v3 = vld [vmem:[#allocation2 + $0x8] sm:$0xff]  ;;  %v103_v5 = vld [vmem:[#allocation5] sm:$0xff]  ;;  %s146_s5 = sshll.u32 %s312_s4, 4  ;;  %s147_s5 = int_to_ptr.vmem [resolvable:$true] %s146_s5 }
  0x5b   :  { %v96_v4 = vsub.f32 %v94_v2, %v92_v0  ;;  %v104_v6 = vld [vmem:[#allocation5 + $0x8] sm:$0xff]  ;;  %v97_v7 = vsub.f32 %v95_v3, %v93_v1  ;;  %v105_v8 = vsub.f32 %v103_v5, %v92_v0  ;;  %v112_v10 = vld [vmem:[#allocation7] sm:$0xff]  ;;  %v113_v11 = vld [vmem:[#allocation7 + $0x8] sm:$0xff]  ;;  %s275_s9 = scalar_lea.vmem %s147_s5, 128  ;;  %p280_p13 = scmp.lt.s32.totalorder %s147_s5, %s147_s5 }
  0x5c   :  { %v106_v9 = vsub.f32 %v104_v6, %v93_v1  ;;  %v121_v12 = vld [vmem:[#allocation8] sm:$0xff]  ;;  %v114_v14 = vsub.f32 %v112_v10, %v92_v0  ;;  %v115_v15 = vsub.f32 %v113_v11, %v93_v1  ;;  %v122_v16 = vld [vmem:[#allocation8 + $0x8] sm:$0xff]  ;;  %v130_v18 = vld [vmem:[#allocation10] sm:$0xff]  ;;  %p276_p12 = scmp.ne.s32.totalorder %s147_s5, %s275_s9  ;;  %p281_p0 = scmp.lt.s32.totalorder %s275_s9, %s275_s9 }
  0x5d   :  { %v98_v13 = vmul.f32 %v96_v4, %v96_v4  ;;  %v123_v17 = vsub.f32 %v121_v12, %v92_v0  ;;  %v131_v19 = vld [vmem:[#allocation10 + $0x8] sm:$0xff]  ;;  %v99_v20 = vmul.f32 %v97_v7, %v97_v7  ;;  %v107_v21 = vmul.f32 %v105_v8, %v105_v8 }
  0x5e   :  { %v108_v22 = vmul.f32 %v106_v9, %v106_v9  ;;  %v124_v23 = vsub.f32 %v122_v16, %v93_v1  ;;  %v116_v24 = vmul.f32 %v114_v14, %v114_v14  ;;  %v117_v25 = vmul.f32 %v115_v15, %v115_v15  ;;  %p282_p1 = por %p281_p0, %p280_p13 }
  0x5f   :  { %v125_v26 = vmul.f32 %v123_v17, %v123_v17  ;;  %v132_v27 = vsub.f32 %v130_v18, %v92_v0  ;;  %v100_v28 = vadd.f32 %v99_v20, %v98_v13  ;;  %v133_v31 = vsub.f32 %v131_v19, %v93_v1 }
  0x60   :  { %v109_v29 = vadd.f32 %v108_v22, %v107_v21  ;;  %v126_v30 = vmul.f32 %v124_v23, %v124_v23  ;;  %v118_v32 = vadd.f32 %v117_v25, %v116_v24  ;;  %p283_p2 = pnand %p282_p1, %p276_p12 }
  0x61   :  { %v134_v33 = vmul.f32 %v132_v27, %v132_v27  ;;  %v101_v34 = vmul.f32 0.00048828125, %v100_v28  ;;  %v135_v37 = vmul.f32 %v133_v31, %v133_v31 }
  0x62   :  { %v110_v35 = vmul.f32 0.000390625, %v109_v29  ;;  %v127_v36 = vadd.f32 %v126_v30, %v125_v26  ;;  %v119_v38 = vmul.f32 0.00029296876, %v118_v32 }
  0x63   :  { %v136_v41 = vadd.f32 %v135_v37, %v134_v33 }
  0x64   :  { %v111_v39 = vadd.f32 %v110_v35, %v101_v34  ;;  %v128_v40 = vmul.f32 0.0001953125, %v127_v36 }
  0x65   :  { %v137_v43 = vmul.f32 9.765625e-05, %v136_v41 }
  0x66   :  { %v120_v42 = vadd.f32 %v119_v38, %v111_v39 }
  0x68   :  { %v129_v44 = vadd.f32 %v128_v40, %v120_v42 }
  0x6a   :  { %v138_v45 = vadd.f32 %v137_v43, %v129_v44 }
  0x6c   :  { %139 = vst [vmem:[#allocation11] sm:$0xff] %v138_v45 }
  0x6d   :  { %286 = shalt.err (!%p283_p2)
}
  0x6e   :  { %s287_s14 = scalar_lea.hbm %s461_s6, 128 }
  0x6f   :  { %p288_p3 = scmp.ne.s32.totalorder %s461_s6, %s287_s14  ;;  %p291_p4 = scmp.lt.u32.totalorder %s287_s14, %s461_s6 }
  0x71   :  { %p293_p5 = pnand %p291_p4, %p288_p3 }
  0x73   :  { %296 = shalt.err (!%p293_p5)
}
  0x74   :  { %149 = dma.vmem_to_hbm [thread:$0]  %s147_s5, 128, %s461_s6, [#allocation4]  }
  0x75   :  { %303 = dma.done.wait [#allocation4], 128  }
  0x76   :  { %304 = vsyncadd [#allocation4], 4294967168 }
  0x77   :  { %153 = vsyncpa [#allocation3], 1 }
  0x78   :  { %154 = vsyncpa [#allocation6], 1 }
  0x79   :  { %155 = vsyncpa [#allocation9], 1 }
  0x7a   :  { %156 = vsyncpa [#allocation4], 1 }

</bundles_post_ra>
